<compile_context>
chip_gen: v5e
topology: v5e:2x2
jax: 0.10.0
libtpu: 0.0.40
codegen_flags: <defaults>
</compile_context>

<pallas_src>
import jax
import jax.numpy as jnp
from jax.experimental import pallas as pl
from jax.experimental.pallas import tpu as pltpu


def _round_up(n, m):
    return ((n + m - 1) // m) * m


def pownet_kernel(x_ref, w1_ref, b1_ref, w2_ref, b2_ref, o_ref):
    # fc1 + ReLU: bf16 operands on the MXU, f32 accumulation, f32 bias/activation.
    x = x_ref[...].astype(w1_ref.dtype)           # no-op if the producer already emits bf16
    h = jnp.dot(x, w1_ref[...], preferred_element_type=jnp.float32)
    h = jnp.maximum(h + b1_ref[...], 0.0)         # (T,16) + (1,16) broadcast
    # fc2 straight to the real (T,10) output block -- no lane padding, no wrapper slice.
    z = jnp.dot(h.astype(w2_ref.dtype), w2_ref[...],
                preferred_element_type=jnp.float32)
    z = z + b2_ref[...]                           # (T,10) + (1,10) broadcast
    # sigmoid(z)*2 + 1 == tanh(z/2) + 2  (single EUP transcendental, minimal VPU epilogue).
    o_ref[...] = (jnp.tanh(z * 0.5) + 2.0).astype(o_ref.dtype)


def _resident_spec(shape):
    """BlockSpec for a grid-invariant (VMEM-resident) operand; single-buffered if supported."""
    buffered = getattr(pl, "Buffered", None)
    if buffered is not None:
        try:
            return pl.BlockSpec(shape, lambda i: (0, 0), pipeline_mode=buffered(1))
        except TypeError:
            pass  # older JAX without pipeline_mode on BlockSpec
    return pl.BlockSpec(shape, lambda i: (0, 0))


def pownet_forward(x, w1, b1, w2, b2, *, tile_rows=8192, min_steps=6,
                   compute_dtype=jnp.bfloat16, out_dtype=jnp.float32):
    """Forward pass of PowNet.  Weights are (in_features, out_features): y = act(x @ W + b)."""
    B, inputdim = x.shape
    hidden = w1.shape[1]
    out_dim = w2.shape[1]

    b1 = b1.reshape(1, hidden).astype(jnp.float32)
    b2 = b2.reshape(1, out_dim).astype(jnp.float32)

    # bf16 weights for the MXU fast path (a few KiB, fetched once, VMEM-resident).
    w1c = w1.astype(compute_dtype)
    w2c = w2.astype(compute_dtype)

    # Row tile: as large as possible (amortize per-step overhead), but aim for >= min_steps
    # grid steps on big batches so v7x's two TensorCores both get work.  Always 8-aligned.
    max_tile = max(8, _round_up(tile_rows, 8))
    tile = _round_up(pl.cdiv(B, max(1, min_steps)), 8)
    tile = max(8, min(tile, max_tile, _round_up(B, 8)))
    grid = (pl.cdiv(B, tile),)

    # Advisory cost model: 2 small GEMMs + tanh epilogue; bytes dominated by x read + out write.
    out_itemsize = jnp.dtype(out_dtype).itemsize
    flops = 2 * B * (inputdim * hidden + hidden * out_dim) + 4 * B * out_dim
    transcendentals = B * out_dim
    bytes_accessed = (x.size * x.dtype.itemsize
                      + B * out_dim * out_itemsize
                      + w1c.size * w1c.dtype.itemsize + w2c.size * w2c.dtype.itemsize
                      + (b1.size + b2.size) * 4)
    cost = pl.CostEstimate(flops=flops, transcendentals=transcendentals,
                           bytes_accessed=bytes_accessed)

    return pl.pallas_call(
        pownet_kernel,
        out_shape=jax.ShapeDtypeStruct((B, out_dim), out_dtype),
        grid=grid,
        in_specs=[
            pl.BlockSpec((tile, inputdim), lambda i: (i, 0)),   # x: streamed per row tile
            _resident_spec((inputdim, hidden)),                  # w1: resident
            _resident_spec((1, hidden)),                         # b1: resident
            _resident_spec((hidden, out_dim)),                   # w2: resident
            _resident_spec((1, out_dim)),                        # b2: resident
        ],
        out_specs=pl.BlockSpec((tile, out_dim), lambda i: (i, 0)),  # (tile,10): 10 == full minor dim
        compiler_params=pltpu.CompilerParams(
            dimension_semantics=("parallel",),   # v7x: shard row tiles across both TCs
        ),
        cost_estimate=cost,
    )(x, w1c, b1, w2c, b2)


def init_pownet_params(key, inputdim):
    """PyTorch nn.Linear-style init (U[-1/sqrt(fan_in), 1/sqrt(fan_in)]).

    Weights are stored transposed relative to PyTorch, i.e. (in_features, out_features),
    so the kernel computes x @ W + b directly.
    """
    k1, k2, k3, k4 = jax.random.split(key, 4)
    bound1 = 1.0 / jnp.sqrt(jnp.float32(inputdim))
    w1 = jax.random.uniform(k1, (inputdim, 16), jnp.float32, -bound1, bound1)
    b1 = jax.random.uniform(k2, (1, 16), jnp.float32, -bound1, bound1)
    bound2 = 1.0 / jnp.sqrt(jnp.float32(16))
    w2 = jax.random.uniform(k3, (16, 10), jnp.float32, -bound2, bound2)
    b2 = jax.random.uniform(k4, (1, 10), jnp.float32, -bound2, bound2)
    return w1, b1, w2, b2


if __name__ == "__main__":
    key = jax.random.PRNGKey(0)
    kx, kp, kx2 = jax.random.split(key, 3)

    inputdim = 32
    w1, b1, w2, b2 = init_pownet_params(kp, inputdim)

    def ref_fwd(x, dot_dtype):
        """Plain-JAX reference; dot_dtype selects f32 or bf16-emulated matmuls."""
        h = jnp.dot(x.astype(dot_dtype), w1.astype(dot_dtype),
                    preferred_element_type=jnp.float32) + b1
        h = jnp.maximum(h, 0.0)
        z = jnp.dot(h.astype(dot_dtype), w2.astype(dot_dtype),
                    preferred_element_type=jnp.float32) + b2
        return jax.nn.sigmoid(z) * 2.0 + 1.0

    # --- small f32 batch (single grid step) ---
    batch = 8
    x_small = jax.random.normal(kx, (batch, inputdim), jnp.float32)
    out_small = jax.block_until_ready(pownet_forward(x_small, w1, b1, w2, b2))
    assert out_small.shape == (batch, 10)
    # Exact-path check (same bf16 matmuls as the kernel; tanh==sigmoid*2+1 up to ~1e-7).
    assert jnp.allclose(out_small, ref_fwd(x_small, jnp.bfloat16), atol=3e-3, rtol=0)
    # Semantics check vs. the f32 PyTorch math (tolerance covers bf16 matmul rounding;
    # outputs live in [1, 3]).
    assert jnp.allclose(out_small, ref_fwd(x_small, jnp.float32), atol=1e-1, rtol=0)

    # --- multi-tile pipelined path, with bf16 x straight from the "producer"
    #     (halves the dominant HBM read stream; kernel accepts either dtype) ---
    batch2 = 64   # tile = round_up(cdiv(64,6),8) = 16 -> 4 grid steps
    x_big = jax.random.normal(kx2, (batch2, inputdim), jnp.float32).astype(jnp.bfloat16)
    out_big = jax.block_until_ready(pownet_forward(x_big, w1, b1, w2, b2))
    assert out_big.shape == (batch2, 10)
    x_big_f32 = x_big.astype(jnp.float32)
    assert jnp.allclose(out_big, ref_fwd(x_big_f32, jnp.bfloat16), atol=3e-3, rtol=0)
    assert jnp.allclose(out_big, ref_fwd(x_big_f32, jnp.float32), atol=1e-1, rtol=0)

    print("KERNEL_OK")
</pallas_src>

<mosaic_0001>
module attributes {stable_mosaic.version = 11 : i64} {
  func.func @pownet_kernel(%arg0: i32, %arg1: memref<8x32xf32, #tpu.memory_space<vmem>>, %arg2: memref<32x16xbf16, #tpu.memory_space<vmem>>, %arg3: memref<1x16xf32, #tpu.memory_space<vmem>>, %arg4: memref<16x10xbf16, #tpu.memory_space<vmem>>, %arg5: memref<1x10xf32, #tpu.memory_space<vmem>>, %arg6: memref<8x10xf32, #tpu.memory_space<vmem>>) attributes {dimension_semantics = [#tpu.dimension_semantics<parallel>], iteration_bounds = array<i64: 1>, scalar_prefetch = 0 : i64, scratch_operands = 0 : i64, tpu.core_type = #tpu.core_type<tc>, window_params = [{transform_indices = @transform_0, window_bounds = array<i64: 8, 32>}, {pipeline_mode = #tpu.pipeline_mode<synchronous>, transform_indices = @transform_1, window_bounds = array<i64: 32, 16>}, {pipeline_mode = #tpu.pipeline_mode<synchronous>, transform_indices = @transform_2, window_bounds = array<i64: 1, 16>}, {pipeline_mode = #tpu.pipeline_mode<synchronous>, transform_indices = @transform_3, window_bounds = array<i64: 16, 10>}, {pipeline_mode = #tpu.pipeline_mode<synchronous>, transform_indices = @transform_4, window_bounds = array<i64: 1, 10>}, {transform_indices = @transform_5, window_bounds = array<i64: 8, 10>}]} {
    %c0 = arith.constant 0 : index
    %c0_0 = arith.constant 0 : index
    %0 = vector.load %arg1[%c0, %c0_0] : memref<8x32xf32, #tpu.memory_space<vmem>>, vector<8x32xf32>
    %1 = arith.truncf %0 : vector<8x32xf32> to vector<8x32xbf16>
    %c0_1 = arith.constant 0 : index
    %c0_2 = arith.constant 0 : index
    %2 = vector.load %arg2[%c0_1, %c0_2] : memref<32x16xbf16, #tpu.memory_space<vmem>>, vector<32x16xbf16>
    %cst = arith.constant dense<0.000000e+00> : vector<8x16xf32>
    %3 = tpu.matmul %1, %2, %cst {dimension_numbers = #tpu.dot_dimension_numbers<[1], [0], [0], [1], [0, 0, 1, 1], [], []>} : vector<8x32xbf16>, vector<32x16xbf16>, vector<8x16xf32> -> vector<8x16xf32>
    %c0_3 = arith.constant 0 : index
    %c0_4 = arith.constant 0 : index
    %4 = vector.load %arg3[%c0_3, %c0_4] : memref<1x16xf32, #tpu.memory_space<vmem>>, vector<1x16xf32>
    %5 = vector.broadcast %4 : vector<1x16xf32> to vector<8x16xf32>
    %6 = arith.addf %3, %5 : vector<8x16xf32>
    %cst_5 = arith.constant 0.000000e+00 : f32
    %7 = vector.broadcast %cst_5 : f32 to vector<8x16xf32>
    %8 = arith.maximumf %6, %7 : vector<8x16xf32>
    %9 = arith.truncf %8 : vector<8x16xf32> to vector<8x16xbf16>
    %c0_6 = arith.constant 0 : index
    %c0_7 = arith.constant 0 : index
    %10 = vector.load %arg4[%c0_6, %c0_7] : memref<16x10xbf16, #tpu.memory_space<vmem>>, vector<16x10xbf16>
    %cst_8 = arith.constant dense<0.000000e+00> : vector<8x10xf32>
    %11 = tpu.matmul %9, %10, %cst_8 {dimension_numbers = #tpu.dot_dimension_numbers<[1], [0], [0], [1], [0, 0, 1, 1], [], []>} : vector<8x16xbf16>, vector<16x10xbf16>, vector<8x10xf32> -> vector<8x10xf32>
    %c0_9 = arith.constant 0 : index
    %c0_10 = arith.constant 0 : index
    %12 = vector.load %arg5[%c0_9, %c0_10] : memref<1x10xf32, #tpu.memory_space<vmem>>, vector<1x10xf32>
    %13 = vector.broadcast %12 : vector<1x10xf32> to vector<8x10xf32>
    %14 = arith.addf %11, %13 : vector<8x10xf32>
    %cst_11 = arith.constant 5.000000e-01 : f32
    %15 = vector.broadcast %cst_11 : f32 to vector<8x10xf32>
    %16 = arith.mulf %14, %15 : vector<8x10xf32>
    %17 = math.tanh %16 : vector<8x10xf32>
    %cst_12 = arith.constant 2.000000e+00 : f32
    %18 = vector.broadcast %cst_12 : f32 to vector<8x10xf32>
    %19 = arith.addf %17, %18 : vector<8x10xf32>
    %c0_13 = arith.constant 0 : index
    %c0_14 = arith.constant 0 : index
    %20 = vector.load %arg6[%c0_13, %c0_14] : memref<8x10xf32, #tpu.memory_space<vmem>>, vector<8x10xf32>
    tpu.vector_store %arg6[%c0_13, %c0_14], %19 {strides = array<i32>} : memref<8x10xf32, #tpu.memory_space<vmem>>, vector<8x10xf32>,
    return
  }
  func.func @transform_0(%arg0: i32) -> (i32, i32) {
    %c0_i32 = arith.constant 0 : i32
    %c0_i32_0 = arith.constant 0 : i32
    return %arg0, %c0_i32 : i32, i32
  }
  func.func @transform_1(%arg0: i32) -> (i32, i32) {
    %c0_i32 = arith.constant 0 : i32
    %c0_i32_0 = arith.constant 0 : i32
    %c0_i32_1 = arith.constant 0 : i32
    return %c0_i32, %c0_i32_0 : i32, i32
  }
  func.func @transform_2(%arg0: i32) -> (i32, i32) {
    %c0_i32 = arith.constant 0 : i32
    %c0_i32_0 = arith.constant 0 : i32
    %c0_i32_1 = arith.constant 0 : i32
    return %c0_i32, %c0_i32_0 : i32, i32
  }
  func.func @transform_3(%arg0: i32) -> (i32, i32) {
    %c0_i32 = arith.constant 0 : i32
    %c0_i32_0 = arith.constant 0 : i32
    %c0_i32_1 = arith.constant 0 : i32
    return %c0_i32, %c0_i32_0 : i32, i32
  }
  func.func @transform_4(%arg0: i32) -> (i32, i32) {
    %c0_i32 = arith.constant 0 : i32
    %c0_i32_0 = arith.constant 0 : i32
    %c0_i32_1 = arith.constant 0 : i32
    return %c0_i32, %c0_i32_0 : i32, i32
  }
  func.func @transform_5(%arg0: i32) -> (i32, i32) {
    %c0_i32 = arith.constant 0 : i32
    %c0_i32_0 = arith.constant 0 : i32
    return %arg0, %c0_i32 : i32, i32
  }
}

</mosaic_0001>

<bundles_post_ra>
// kernel: tpu_custom_call.1
= control target key start
LH: loop header
LB: loop body
LE: loop exit
PB: predicated region body
PF: predicated region fallthrough
CT: control target
= control target key end

     0   :  { %s213_s0 = inlined_call_operand.vmem [shape: f32[8,32], index: 0, kind: input, shape index: {}]   ;;  %s214_s1 = inlined_call_operand.vmem [shape: bf16[32,16], index: 1, kind: input, shape index: {}]   ;;  %s215_s2 = inlined_call_operand.vmem [shape: f32[1,16], index: 2, kind: input, shape index: {}]   ;;  %s216_s3 = inlined_call_operand.vmem [shape: bf16[16,10], index: 3, kind: input, shape index: {}]   ;;  %s217_s4 = inlined_call_operand.vmem [shape: f32[1,10], index: 4, kind: input, shape index: {}]   ;;  %s218_s5 = inlined_call_operand.hbm [shape: f32[8,10], index: 5, kind: output, shape index: {}]  }
   0x1   :  { %v128_v0 = vld [vmem:[%s214_s1 + $0x8] sm:$0xff]  ;;  %v127_v1 = vld [vmem:[%s214_s1] sm:$0xff] }
   0x2   :  { %54 = vmatpush.bf16.msra.mxu0 %v128_v0  ;;  %v22_v2 = vld [vmem:[%s213_s0] sm:$0xff] }
   0x3   :  { %10 = vsyncpa [#allocation3], 0  ;;  %v23_v3 = vpack.c.bf16 %v22_v2, %v22_v2  ;;  %vm44_vm0 = vcmask 261120   ;;  %v129_v4 = vld [vmem:[%s216_s3] sm:$0xff]  ;;  %vm75_vm1 = vcmask 130048   ;;  %s161_s3 = smov [#allocation2]  }
   0x4   :  { %86 = vmatpush.bf16.msra.mxu1 %v129_v4  ;;  %v131_v5 = vld [vmem:[%s215_s2] ss:$0 sm:$0xff]  ;;  %s102_s28 = sshll.u32 %s161_s3, 4  ;;  %s104_s30 = sshll.u32 %s218_s5, 4  ;;  %vm95_vm2 = vcmask 80896   ;;  %s103_s28 = int_to_ptr.vmem [resolvable:$true] %s102_s28  ;;  %s105_s30 = int_to_ptr.hbm [resolvable:$true] %s104_s30 }
   0x5   :  { %v132_v11 = vld [vmem:[%s217_s4] ss:$0 sm:$0xff] }
   0x6   :  { %55 = vmatpush.bf16.msra.mxu0 %v127_v1 }
   0x9   :  { %121 = vmatmul.msk.bf16.vlgmr.msra.gmra.mxu0 %vm44_vm0, %v23_v3 }
  0x86   :  { %v57_v6 = vpop.f32.mrf.mxu0 }
  0x87   :  { %v58_v7 = vadd.f32 %v131_v5, %v57_v6 }
  0x89   :  { %v61_v8 = vmax.f32 %v58_v7, 0.0 }
  0x8b   :  { %v62_v9 = vpack.c.bf16 %v61_v8, %v61_v8 }
  0x8d   :  { %126 = vmatmul.msk.bf16.vlgmr.msra.gmra.mxu1 %vm75_vm1, %v62_v9 }
  0x8e   :  { %v59_v10 = vpop.f32.mrf.mxu0 }
 0x10a   :  { %v88_v12 = vpop.f32.mrf.mxu1 }
 0x10b   :  { %v89_v13 = vadd.f32 %v132_v11, %v88_v12 }
 0x10d   :  { %v92_v14 = vmul.f32 0.5, %v89_v13 }
 0x10f   :  { %133 = vtanh.f32 %v92_v14 }
 0x112   :  { %v90_v15 = vpop.f32.mrf.mxu1 }
 0x115   :  { %v134_v16 = vpop.eup %133 }
 0x116   :  { %v94_v17 = vadd.f32 2.0, %v134_v16 }
 0x118   :  { %96 = vst.msk [vmem:[#allocation2] sm:$0xff] %vm95_vm2, %v94_v17 }
 0x119   :  { %107 = dma.vmem_to_hbm [thread:$0]  %s103_s28, 128, %s105_s30, [#allocation3]  }
 0x11a   :  { %159 = dma.done.wait [#allocation3], 128  }
 0x11b   :  { %160 = vsyncadd [#allocation3], 4294967168 }
 0x11c   :  { %112 = vsyncpa [#allocation3], 1 }

</bundles_post_ra>
